<compile_context>
chip_gen: v7x
topology: tpu7x:2x2x1
jax: 0.10.0
libtpu: 0.0.40
codegen_flags: <defaults>
</compile_context>

<pallas_src>
import functools

import jax
import jax.numpy as jnp
from jax.experimental import pallas as pl
from jax.experimental.pallas import tpu as pltpu


def _round_up(x: int, m: int) -> int:
    return ((x + m - 1) // m) * m


def _pad_cast(a, shape, dtype):
    """Cast to `dtype` and zero-pad up to `shape` (skips the copy when aligned)."""
    a = a.astype(dtype)
    if a.shape == shape:
        return a
    return jnp.zeros(shape, dtype).at[tuple(slice(0, s) for s in a.shape)].set(a)


def _make_head_kernel(p_drop: float, apply_dropout: bool, use_hw_prng: bool):
    """Builds the fused classification-head kernel body.

    Dropout uses a 16-bit integer threshold (Python int -> jaxpr literal, no
    captured constants).  The 1/(1-p) keep-scale is folded into the weights by
    the wrapper, so dropout here is a pure mask select.
    """
    thresh = min(max(int(round(p_drop * 65536.0)), 0), 65536)

    def dropout(v, bits16):
        return jnp.where(bits16 >= thresh, v, 0.0)

    def body(x, w1, b1, w2, b2, o_ref, bits32=None):
        if apply_dropout:
            # Low / high 16 bits of one 32-bit plane drive the two dropout masks
            # (mask with 0xFFFF so signed/unsigned bit dtypes both work).
            x = dropout(x, bits32 & 0xFFFF)
        h = jnp.dot(x, w1, preferred_element_type=jnp.float32)   # MXU, f32 acc
        h = jnp.tanh(h + b1)                                     # VPU/EUP in f32
        if apply_dropout:
            h = dropout(h, (bits32 >> 16) & 0xFFFF)
        y = jnp.dot(h.astype(w2.dtype), w2, preferred_element_type=jnp.float32)
        o_ref[...] = (y + b2).astype(o_ref.dtype)

    if not apply_dropout:
        def kernel(x_ref, w1_ref, b1_ref, w2_ref, b2_ref, o_ref):
            body(x_ref[...], w1_ref[...], b1_ref[...], w2_ref[...], b2_ref[...],
                 o_ref)
    elif use_hw_prng:
        def kernel(seed_ref, x_ref, w1_ref, b1_ref, w2_ref, b2_ref, o_ref):
            # Per-tile seed; random bits generated on chip -> no HBM bits stream.
            pltpu.prng_seed(seed_ref[0] + pl.program_id(0))
            bits32 = pltpu.prng_random_bits(x_ref.shape)
            body(x_ref[...], w1_ref[...], b1_ref[...], w2_ref[...], b2_ref[...],
                 o_ref, bits32=bits32)
    else:
        def kernel(x_ref, bits_ref, w1_ref, b1_ref, w2_ref, b2_ref, o_ref):
            body(x_ref[...], w1_ref[...], b1_ref[...], w2_ref[...], b2_ref[...],
                 o_ref, bits32=bits_ref[...])

    return kernel


@functools.partial(
    jax.jit,
    static_argnames=("p_drop", "train", "compute_dtype", "batch_tile",
                     "use_hw_prng"),
)
def roberta_classification_head(inp, w_dense, b_dense, w_out, b_out,
                                rng_key=None, *,
                                p_drop=0.1, train=False,
                                compute_dtype=jnp.float32, batch_tile=512,
                                use_hw_prng=True):
    """Fused RoBERTa classification head.

    inp:      (B, H) float
    w_dense:  (H, H)  stored as (in, out)  == torch dense.weight.T
    b_dense:  (H,)
    w_out:    (H, L)  stored as (in, out)  == torch out_proj.weight.T
    b_out:    (L,)
    rng_key:  jax PRNG key (required when train=True and p_drop > 0)

    compute_dtype=jnp.bfloat16 is the recommended fast path on all TPU
    generations; f32 is the default only for bit-exact eval comparison.
    batch_tile=512 suits v5e/v6e (128 MiB VMEM); use <=256 per core on v7x.
    """
    B, H = inp.shape
    L = w_out.shape[1]
    apply_dropout = bool(train) and p_drop > 0.0

    # Lane-dense padding (last dim -> multiple of 128), sublane-aligned batch tile.
    H_pad = _round_up(H, 128)
    L_pad = _round_up(L, 128)
    TB = min(batch_tile, _round_up(B, 8))
    # Ensure >= 2 grid steps whenever the batch allows it so the "parallel" batch
    # axis can shard across both v7x TensorCores (harmless on v5e/v6e).
    if B > 8 and _round_up(B, TB) // TB < 2:
        TB = _round_up(pl.cdiv(B, 2), 8)
    B_pad = _round_up(B, TB)

    # Fold the dropout keep-scale 1/(1-p) into the weights (dropout feeds a
    # linear layer, so this is exact); the kernel dropout is then a pure select.
    if apply_dropout and p_drop < 1.0:
        scale = 1.0 / (1.0 - p_drop)
        w_dense = w_dense * scale
        w_out = w_out * scale

    # Pad + cast once here; the kernel never re-casts the resident weights.
    x_p = _pad_cast(inp, (B_pad, H_pad), compute_dtype)
    w1_p = _pad_cast(w_dense, (H_pad, H_pad), compute_dtype)
    b1_p = _pad_cast(b_dense.reshape(1, H), (1, H_pad), jnp.float32)
    w2_p = _pad_cast(w_out, (H_pad, L_pad), compute_dtype)
    b2_p = _pad_cast(b_out.reshape(1, L), (1, L_pad), jnp.float32)

    act_spec = pl.BlockSpec((TB, H_pad), lambda i: (i, 0))
    resident = lambda shape: pl.BlockSpec(shape, lambda i: (0, 0))

    args, in_specs = [], []
    if apply_dropout:
        if rng_key is None:
            raise ValueError("rng_key is required when train=True and p_drop > 0")
        if use_hw_prng:
            # Scalar seed in SMEM; bits generated on chip inside the kernel.
            seed = jax.random.randint(rng_key, (1,), 0,
                                      jnp.iinfo(jnp.int32).max, dtype=jnp.int32)
            args += [seed, x_p]
            in_specs += [pl.BlockSpec(memory_space=pltpu.MemorySpace.SMEM),
                         act_spec]
        else:
            # Interpret/debug path: a single streamed uint32 plane; its low/high
            # 16 bits drive the two dropout masks.
            bits = jax.random.bits(rng_key, (B_pad, H_pad), dtype=jnp.uint32)
            args += [x_p, bits]
            in_specs += [act_spec, pl.BlockSpec((TB, H_pad), lambda i: (i, 0))]
    else:
        args += [x_p]
        in_specs += [act_spec]

    args += [w1_p, b1_p, w2_p, b2_p]
    in_specs += [
        resident((H_pad, H_pad)),
        resident((1, H_pad)),
        resident((H_pad, L_pad)),
        resident((1, L_pad)),
    ]

    kernel = _make_head_kernel(p_drop, apply_dropout, use_hw_prng)

    out_padded = pl.pallas_call(
        kernel,
        grid=(B_pad // TB,),
        in_specs=in_specs,
        out_specs=pl.BlockSpec((TB, L_pad), lambda i: (i, 0)),
        out_shape=jax.ShapeDtypeStruct((B_pad, L_pad), jnp.float32),
        compiler_params=pltpu.CompilerParams(
            dimension_semantics=("parallel",),
            vmem_limit_bytes=32 * 1024 * 1024,
        ),
    )(*args)

    return out_padded[:B, :L]


if __name__ == "__main__":
    # Small config: hidden_size=32, num_labels=4, batch=8.
    B, H, L = 8, 32, 4
    p_drop = 0.1

    key = jax.random.PRNGKey(0)
    k_inp, k_w1, k_b1, k_w2, k_b2, k_drop = jax.random.split(key, 6)

    inp = jax.random.normal(k_inp, (B, H), dtype=jnp.float32)
    # Weights stored as (in, out) == torch weight.T; deterministic init.
    w_dense = jax.random.normal(k_w1, (H, H), dtype=jnp.float32) * 0.05
    b_dense = jax.random.normal(k_b1, (H,), dtype=jnp.float32) * 0.05
    w_out = jax.random.normal(k_w2, (H, L), dtype=jnp.float32) * 0.05
    b_out = jax.random.normal(k_b2, (L,), dtype=jnp.float32) * 0.05

    # --- Eval mode (dropout = identity), f32 matmuls: exact check vs pure-JAX ref.
    out_eval = roberta_classification_head(
        inp, w_dense, b_dense, w_out, b_out,
        p_drop=p_drop, train=False, compute_dtype=jnp.float32,
    )
    jax.block_until_ready(out_eval)
    ref = jnp.tanh(inp @ w_dense + b_dense) @ w_out + b_out
    assert out_eval.shape == (B, L)
    assert jnp.allclose(out_eval, ref, atol=1e-5, rtol=1e-5), "eval-mode mismatch"

    # --- Eval mode with bf16 matmuls (recommended fast path), loose tolerance.
    out_bf16 = roberta_classification_head(
        inp, w_dense, b_dense, w_out, b_out,
        p_drop=p_drop, train=False, compute_dtype=jnp.bfloat16,
    )
    jax.block_until_ready(out_bf16)
    assert jnp.allclose(out_bf16, ref, atol=2e-2, rtol=2e-2), "bf16 eval mismatch"

    # --- Train mode. The default path uses the on-chip hardware PRNG (no random
    # bits streamed from HBM). Interpret/CPU-emulation environments may not
    # lower the TPU PRNG primitives, so fall back to the streamed-bits debug
    # path in that case.
    try:
        out_train = roberta_classification_head(
            inp, w_dense, b_dense, w_out, b_out, k_drop,
            p_drop=p_drop, train=True, compute_dtype=jnp.float32,
        )
        jax.block_until_ready(out_train)
    except Exception:
        out_train = roberta_classification_head(
            inp, w_dense, b_dense, w_out, b_out, k_drop,
            p_drop=p_drop, train=True, compute_dtype=jnp.float32,
            use_hw_prng=False,
        )
        jax.block_until_ready(out_train)

    assert out_train.shape == (B, L)
    assert jnp.all(jnp.isfinite(out_train))
    # Kept elements are scaled by 1/(1-p), so train output must differ from eval.
    assert not jnp.allclose(out_train, out_eval, atol=1e-6), "dropout had no effect"

    print("KERNEL_OK")
</pallas_src>

<mosaic_0001>
module attributes {stable_mosaic.version = 11 : i64} {
  func.func @kernel(%arg0: i32, %arg1: memref<8x128xf32, #tpu.memory_space<vmem>>, %arg2: memref<128x128xf32, #tpu.memory_space<vmem>>, %arg3: memref<1x128xf32, #tpu.memory_space<vmem>>, %arg4: memref<128x128xf32, #tpu.memory_space<vmem>>, %arg5: memref<1x128xf32, #tpu.memory_space<vmem>>, %arg6: memref<8x128xf32, #tpu.memory_space<vmem>>) attributes {dimension_semantics = [#tpu.dimension_semantics<parallel>], iteration_bounds = array<i64: 1>, scalar_prefetch = 0 : i64, scratch_operands = 0 : i64, tpu.core_type = #tpu.core_type<tc>, window_params = [{transform_indices = @transform_0, window_bounds = array<i64: 8, 128>}, {pipeline_mode = #tpu.pipeline_mode<synchronous>, transform_indices = @transform_1, window_bounds = array<i64: 128, 128>}, {pipeline_mode = #tpu.pipeline_mode<synchronous>, transform_indices = @transform_2, window_bounds = array<i64: 1, 128>}, {pipeline_mode = #tpu.pipeline_mode<synchronous>, transform_indices = @transform_3, window_bounds = array<i64: 128, 128>}, {pipeline_mode = #tpu.pipeline_mode<synchronous>, transform_indices = @transform_4, window_bounds = array<i64: 1, 128>}, {transform_indices = @transform_5, window_bounds = array<i64: 8, 128>}]} {
    %c0 = arith.constant 0 : index
    %c0_0 = arith.constant 0 : index
    %0 = vector.load %arg1[%c0, %c0_0] : memref<8x128xf32, #tpu.memory_space<vmem>>, vector<8x128xf32>
    %c0_1 = arith.constant 0 : index
    %c0_2 = arith.constant 0 : index
    %1 = vector.load %arg2[%c0_1, %c0_2] : memref<128x128xf32, #tpu.memory_space<vmem>>, vector<128x128xf32>
    %c0_3 = arith.constant 0 : index
    %c0_4 = arith.constant 0 : index
    %2 = vector.load %arg3[%c0_3, %c0_4] : memref<1x128xf32, #tpu.memory_space<vmem>>, vector<1x128xf32>
    %c0_5 = arith.constant 0 : index
    %c0_6 = arith.constant 0 : index
    %3 = vector.load %arg4[%c0_5, %c0_6] : memref<128x128xf32, #tpu.memory_space<vmem>>, vector<128x128xf32>
    %c0_7 = arith.constant 0 : index
    %c0_8 = arith.constant 0 : index
    %4 = vector.load %arg5[%c0_7, %c0_8] : memref<1x128xf32, #tpu.memory_space<vmem>>, vector<1x128xf32>
    %cst = arith.constant dense<0.000000e+00> : vector<8x128xf32>
    %5 = tpu.matmul %0, %1, %cst {dimension_numbers = #tpu.dot_dimension_numbers<[1], [0], [0], [1], [0, 0, 1, 1], [], []>} : vector<8x128xf32>, vector<128x128xf32>, vector<8x128xf32> -> vector<8x128xf32>
    %6 = vector.broadcast %2 : vector<1x128xf32> to vector<8x128xf32>
    %7 = arith.addf %5, %6 : vector<8x128xf32>
    %8 = math.tanh %7 : vector<8x128xf32>
    %cst_9 = arith.constant dense<0.000000e+00> : vector<8x128xf32>
    %9 = tpu.matmul %8, %3, %cst_9 {dimension_numbers = #tpu.dot_dimension_numbers<[1], [0], [0], [1], [0, 0, 1, 1], [], []>} : vector<8x128xf32>, vector<128x128xf32>, vector<8x128xf32> -> vector<8x128xf32>
    %10 = vector.broadcast %4 : vector<1x128xf32> to vector<8x128xf32>
    %11 = arith.addf %9, %10 : vector<8x128xf32>
    %c0_10 = arith.constant 0 : index
    %c0_11 = arith.constant 0 : index
    %12 = vector.load %arg6[%c0_10, %c0_11] : memref<8x128xf32, #tpu.memory_space<vmem>>, vector<8x128xf32>
    tpu.vector_store %arg6[%c0_10, %c0_11], %11 {strides = array<i32>} : memref<8x128xf32, #tpu.memory_space<vmem>>, vector<8x128xf32>,
    return
  }
  func.func @transform_0(%arg0: i32) -> (i32, i32) {
    %c0_i32 = arith.constant 0 : i32
    %c0_i32_0 = arith.constant 0 : i32
    return %arg0, %c0_i32 : i32, i32
  }
  func.func @transform_1(%arg0: i32) -> (i32, i32) {
    %c0_i32 = arith.constant 0 : i32
    %c0_i32_0 = arith.constant 0 : i32
    %c0_i32_1 = arith.constant 0 : i32
    return %c0_i32, %c0_i32_0 : i32, i32
  }
  func.func @transform_2(%arg0: i32) -> (i32, i32) {
    %c0_i32 = arith.constant 0 : i32
    %c0_i32_0 = arith.constant 0 : i32
    %c0_i32_1 = arith.constant 0 : i32
    return %c0_i32, %c0_i32_0 : i32, i32
  }
  func.func @transform_3(%arg0: i32) -> (i32, i32) {
    %c0_i32 = arith.constant 0 : i32
    %c0_i32_0 = arith.constant 0 : i32
    %c0_i32_1 = arith.constant 0 : i32
    return %c0_i32, %c0_i32_0 : i32, i32
  }
  func.func @transform_4(%arg0: i32) -> (i32, i32) {
    %c0_i32 = arith.constant 0 : i32
    %c0_i32_0 = arith.constant 0 : i32
    %c0_i32_1 = arith.constant 0 : i32
    return %c0_i32, %c0_i32_0 : i32, i32
  }
  func.func @transform_5(%arg0: i32) -> (i32, i32) {
    %c0_i32 = arith.constant 0 : i32
    %c0_i32_0 = arith.constant 0 : i32
    return %arg0, %c0_i32 : i32, i32
  }
}

</mosaic_0001>

<bundles_post_ra>
// kernel: roberta_classification_head.1
= control target key start
LH: loop header
LB: loop body
LE: loop exit
PB: predicated region body
PF: predicated region fallthrough
CT: control target
= control target key end

     0   :  { %v372_v0 = vmov 0.0|0.0   ;;  %vm373_vm0 = vmmov 0   ;;  %v374_v4 = vmov 0.0   ;;  %s529_s1 = inlined_call_operand.vmem [shape: f32[128,128], index: 1, kind: input, shape index: {}]   ;;  %s530_s3 = inlined_call_operand.vmem [shape: f32[128,128], index: 3, kind: input, shape index: {}]   ;;  %s531_s0 = inlined_call_operand.vmem [shape: f32[8,128], index: 0, kind: input, shape index: {}]   ;;  %s532_s2 = inlined_call_operand.vmem [shape: f32[1,128], index: 2, kind: input, shape index: {}]   ;;  %s533_s4 = inlined_call_operand.vmem [shape: f32[1,128], index: 4, kind: input, shape index: {}]   ;;  %s534_s5 = inlined_call_operand.vmem [shape: f32[8,128], index: 5, kind: output, shape index: {}]  }
   0x1   :  { %319 = vmatprep.subr.bf16.mxu0 %v372_v0  ;;  %v21_v1 = vld [vmem:[%s529_s1] sm:$0xff]  ;;  %v22_v2 = vld [vmem:[%s529_s1 + $0x8] sm:$0xff]  ;;  %v23_v3 = vld [vmem:[%s529_s1 + $0x10] sm:$0xff]  ;;  %281 = vmatprep.mubr.msk.f32.mxu0 %vm373_vm0, %v374_v4 }
   0x2   :  { %v320_v5 = vpack.c.bf16 %v22_v2, %v21_v1  ;;  %v24_v6 = vld [vmem:[%s529_s1 + $0x18] sm:$0xff]  ;;  %343 = vmatprep.subr.bf16.mxu1 %v372_v0  ;;  %316 = vmatprep.mubr.msk.f32.mxu1 %vm373_vm0, %v374_v4  ;;  %v25_v8 = vld [vmem:[%s529_s1 + $0x20] sm:$0xff]  ;;  %v26_v9 = vld [vmem:[%s529_s1 + $0x28] sm:$0xff] }
   0x3   :  { %v323_v7 = vpack.c.bf16 %v24_v6, %v23_v3  ;;  %v38_v10 = vld [vmem:[%s530_s3] sm:$0xff]  ;;  %v39_v11 = vld [vmem:[%s530_s3 + $0x8] sm:$0xff]  ;;  %v40_v12 = vld [vmem:[%s530_s3 + $0x10] sm:$0xff]  ;;  %v326_v14 = vpack.c.bf16 %v26_v9, %v25_v8 }
   0x4   :  { %321 = vmatpush3.bf16.msra.mxu0 %v320_v5  ;;  %v41_v13 = vld [vmem:[%s530_s3 + $0x18] sm:$0xff]  ;;  %v344_v15 = vpack.c.bf16 %v39_v11, %v38_v10  ;;  %v27_v16 = vld [vmem:[%s529_s1 + $0x30] sm:$0xff]  ;;  %v42_v19 = vld [vmem:[%s530_s3 + $0x20] sm:$0xff] }
   0x5   :  { %322 = vmatprep.subr.bf16.mxu0 %v372_v0  ;;  %v28_v17 = vld [vmem:[%s529_s1 + $0x38] sm:$0xff]  ;;  %v347_v18 = vpack.c.bf16 %v41_v13, %v40_v12  ;;  %v43_v20 = vld [vmem:[%s530_s3 + $0x28] sm:$0xff]  ;;  %v29_v22 = vld [vmem:[%s529_s1 + $0x40] sm:$0xff] }
   0x6   :  { %345 = vmatpush3.bf16.msra.mxu1 %v344_v15  ;;  %v329_v21 = vpack.c.bf16 %v28_v17, %v27_v16  ;;  %v30_v23 = vld [vmem:[%s529_s1 + $0x48] sm:$0xff]  ;;  %v350_v24 = vpack.c.bf16 %v43_v20, %v42_v19  ;;  %v44_v25 = vld [vmem:[%s530_s3 + $0x30] sm:$0xff]  ;;  %v45_v26 = vld [vmem:[%s530_s3 + $0x38] sm:$0xff] }
   0x7   :  { %346 = vmatprep.subr.bf16.mxu1 %v372_v0  ;;  %v332_v27 = vpack.c.bf16 %v30_v23, %v29_v22  ;;  %v31_v28 = vld [vmem:[%s529_s1 + $0x50] sm:$0xff]  ;;  %v32_v29 = vld [vmem:[%s529_s1 + $0x58] sm:$0xff]  ;;  %v353_v30 = vpack.c.bf16 %v45_v26, %v44_v25  ;;  %v46_v31 = vld [vmem:[%s530_s3 + $0x40] sm:$0xff] }
   0x8   :  { %324 = vmatpush3.bf16.msra.mxu0 %v323_v7  ;;  %v47_v32 = vld [vmem:[%s530_s3 + $0x48] sm:$0xff]  ;;  %v335_v33 = vpack.c.bf16 %v32_v29, %v31_v28  ;;  %v33_v34 = vld [vmem:[%s529_s1 + $0x60] sm:$0xff]  ;;  %v35_v38 = vld [vmem:[%s529_s1 + $0x70] sm:$0xff] }
   0x9   :  { %325 = vmatprep.subr.bf16.mxu0 %v372_v0  ;;  %v34_v35 = vld [vmem:[%s529_s1 + $0x68] sm:$0xff]  ;;  %v356_v36 = vpack.c.bf16 %v47_v32, %v46_v31  ;;  %v36_v39 = vld [vmem:[%s529_s1 + $0x78] sm:$0xff]  ;;  %v20_v41 = vld [vmem:[%s531_s0] sm:$0xff] }
   0xa   :  { %348 = vmatpush3.bf16.msra.mxu1 %v347_v18  ;;  %v338_v37 = vpack.c.bf16 %v34_v35, %v33_v34  ;;  %v341_v40 = vpack.c.bf16 %v36_v39, %v35_v38  ;;  %v48_v42 = vld [vmem:[%s530_s3 + $0x50] sm:$0xff]  ;;  %v49_v43 = vld [vmem:[%s530_s3 + $0x58] sm:$0xff]  ;;  %v50_v45 = vld [vmem:[%s530_s3 + $0x60] sm:$0xff] }
   0xb   :  { %349 = vmatprep.subr.bf16.mxu1 %v372_v0  ;;  %v359_v44 = vpack.c.bf16 %v49_v43, %v48_v42  ;;  %v51_v46 = vld [vmem:[%s530_s3 + $0x68] sm:$0xff]  ;;  %v52_v48 = vld [vmem:[%s530_s3 + $0x70] sm:$0xff]  ;;  %v53_v49 = vld [vmem:[%s530_s3 + $0x78] sm:$0xff] }
   0xc   :  { %327 = vmatpush3.bf16.msra.mxu0 %v326_v14  ;;  %v362_v47 = vpack.c.bf16 %v51_v46, %v50_v45  ;;  %v365_v50 = vpack.c.bf16 %v53_v49, %v52_v48  ;;  %v213_v51 = vld [vmem:[%s532_s2] ss:$0 sm:$0xff] }
   0xd   :  { %328 = vmatprep.subr.bf16.mxu0 %v372_v0  ;;  %v214_v56 = vld [vmem:[%s533_s4] ss:$0 sm:$0xff] }
   0xe   :  { %351 = vmatpush3.bf16.msra.mxu1 %v350_v24 }
   0xf   :  { %352 = vmatprep.subr.bf16.mxu1 %v372_v0 }
  0x10   :  { %330 = vmatpush3.bf16.msra.mxu0 %v329_v21 }
  0x11   :  { %331 = vmatprep.subr.bf16.mxu0 %v372_v0 }
  0x12   :  { %354 = vmatpush3.bf16.msra.mxu1 %v353_v30 }
  0x13   :  { %355 = vmatprep.subr.bf16.mxu1 %v372_v0 }
  0x14   :  { %333 = vmatpush3.bf16.msra.mxu0 %v332_v27 }
  0x15   :  { %334 = vmatprep.subr.bf16.mxu0 %v372_v0 }
  0x16   :  { %357 = vmatpush3.bf16.msra.mxu1 %v356_v36 }
  0x17   :  { %358 = vmatprep.subr.bf16.mxu1 %v372_v0 }
  0x18   :  { %336 = vmatpush3.bf16.msra.mxu0 %v335_v33 }
  0x19   :  { %337 = vmatprep.subr.bf16.mxu0 %v372_v0 }
  0x1a   :  { %360 = vmatpush3.bf16.msra.mxu1 %v359_v44 }
  0x1b   :  { %361 = vmatprep.subr.bf16.mxu1 %v372_v0 }
  0x1c   :  { %339 = vmatpush3.bf16.msra.mxu0 %v338_v37 }
  0x1d   :  { %340 = vmatprep.subr.bf16.mxu0 %v372_v0 }
  0x1e   :  { %363 = vmatpush3.bf16.msra.mxu1 %v362_v47 }
  0x1f   :  { %364 = vmatprep.subr.bf16.mxu1 %v372_v0 }
  0x20   :  { %342 = vmatpush3.bf16.msra.mxu0 %v341_v40 }
  0x22   :  { %366 = vmatpush3.bf16.msra.mxu1 %v365_v50 }
  0x23   :  { %282 = vmatmul.mubr.f32.vlgmr.msra.gmra.mrb[0].mxu0 %v20_v41 }
  0xf6   :  { %v127_v52 = vpop.f32.mrb[0].mxu0 }
  0xf7   :  { %v128_v53 = vadd.f32 %v213_v51, %v127_v52  ;;  %v283_v54 = vpop.f32.mrb[1].mxu0 }
  0xf9   :  { %370 = vtanh.f32 %v128_v53 }
 0x103   :  { %v371_v55 = vpop.eup %370 }
 0x104   :  { %317 = vmatmul.mubr.f32.vlgmr.msra.gmra.mrb[0].mxu1 %v371_v55 }
 0x1d7   :  { %v204_v57 = vpop.f32.mrb[0].mxu1 }
 0x1d8   :  { %v205_v58 = vadd.f32 %v214_v56, %v204_v57  ;;  %v318_v59 = vpop.f32.mrb[1].mxu1 }
 0x1da   :  { %208 = vst [vmem:[%s534_s5] sm:$0xff] %v205_v58 }

</bundles_post_ra>
